<compile_context>
chip_gen: v6e
topology: v6e:2x2x1
jax: 0.10.0
libtpu: 0.0.40
codegen_flags: <defaults>
</compile_context>

<pallas_src>
import math

import jax
import jax.numpy as jnp
from jax.experimental import pallas as pl
from jax.experimental.pallas import tpu as pltpu


def icv_kernel(x_ref, icv_ref, o_ref):
    # x_ref:   VMEM (TS, Hk) row tile
    # icv_ref: VMEM (1, Hk)  pre-scaled steering vector (same block every step)
    # o_ref:   VMEM (TS, Hk) output tile (aliased with x)
    o_ref[...] = x_ref[...] + icv_ref[...]


def _choose_row_tile(rows_k, hk, itemsize, target_bytes=4 << 20):
    """Row tile: multiple of the sublane count, ~target_bytes, small enough to
    give >= 2 grid steps (v7x dual-TC sharding) whenever the slab allows."""
    sub = max(8, 32 // itemsize)          # 8 rows f32, 16 bf16, 32 int8
    if rows_k <= sub:
        return rows_k                     # single block == full array dims
    row_bytes = max(1, hk * itemsize)
    ts = (target_bytes // row_bytes) // sub * sub
    ts = max(sub, ts)
    # Never exceed the slab (rounded down to the sublane multiple); ragged
    # last blocks are handled by cdiv grid + masked boundary writes.
    ts = min(ts, max(sub, (rows_k // sub) * sub))
    # Guarantee >= 2 grid steps so both v7x TensorCores get work.
    if pl.cdiv(rows_k, ts) < 2:
        half = -(-((rows_k + 1) // 2) // sub) * sub   # ceil(rows_k/2) -> mult of sub
        ts = max(sub, min(ts, half))
    return ts


def icv_layer(x, icv, lam):
    """Pallas equivalent of ICVLayer.forward: x + lam * icv (broadcast B, S)."""
    B, S, H = x.shape
    dtype = x.dtype
    itemsize = jnp.dtype(dtype).itemsize

    # Hoist lam * icv out of the kernel; do the product in f32 for accuracy.
    scaled_icv = (jnp.asarray(lam, jnp.float32)
                  * jnp.reshape(icv, (H,)).astype(jnp.float32)).astype(dtype)

    rows = B * S

    # Lane-dense last dim: fold rows into lanes when H isn't 128-aligned and
    # the row count allows it; otherwise pad H up to the next multiple of 128
    # so every store is an unmasked, lane-dense vst.
    k = 1
    pad = 0
    if H % 128 != 0:
        cand = 128 // math.gcd(H, 128)
        if rows % cand == 0:
            k = cand
        else:
            pad = (-H) % 128

    hk = (H + pad) * k                    # exactly one of {pad, k-1} is nonzero
    rows_k = rows // k

    if pad == 0:
        x2 = x.reshape(rows_k, hk)
        icv_row = jnp.tile(scaled_icv, (k,)).reshape(1, hk)
    else:
        x2 = jnp.pad(x.reshape(rows, H), ((0, 0), (0, pad)))
        icv_row = jnp.pad(scaled_icv, (0, pad)).reshape(1, hk)

    ts = _choose_row_tile(rows_k, hk, itemsize)
    grid = (pl.cdiv(rows_k, ts),)

    # Double-buffered working set: 2x input tile + 2x output tile (+ icv row).
    tile_bytes = ts * hk * itemsize
    vmem_limit = int(min(48 << 20, max(16 << 20, 4 * tile_bytes + (4 << 20))))

    out2 = pl.pallas_call(
        icv_kernel,
        out_shape=jax.ShapeDtypeStruct((rows_k, hk), dtype),
        grid=grid,
        in_specs=[
            pl.BlockSpec((ts, hk), lambda i: (i, 0)),   # x row tile
            pl.BlockSpec((1, hk), lambda i: (0, 0)),    # scaled icv (shared)
        ],
        out_specs=pl.BlockSpec((ts, hk), lambda i: (i, 0)),
        input_output_aliases={0: 0},                    # in-place: x -> out
        compiler_params=pltpu.CompilerParams(
            dimension_semantics=("parallel",),
            vmem_limit_bytes=vmem_limit,
        ),
        cost_estimate=pl.CostEstimate(
            flops=rows_k * hk,
            transcendentals=0,
            bytes_accessed=2 * rows_k * hk * itemsize + hk * itemsize,
        ),
    )(x2, icv_row)

    if pad:
        out2 = out2[:, :H]
    return out2.reshape(B, S, H)


# Donate x so input_output_aliases doesn't force a defensive HBM copy of x.
icv_layer_jit = jax.jit(icv_layer, donate_argnums=(0,))


if __name__ == "__main__":
    key = jax.random.PRNGKey(0)
    kx, kv = jax.random.split(key)

    B, S, H = 2, 8, 32
    x = jax.random.normal(kx, (B, S, H), dtype=jnp.float32)
    icv = jax.random.normal(kv, (1, 1, H), dtype=jnp.float32)
    lam = 0.1

    # Reference (pure JAX) of the PyTorch semantics, computed (and blocked)
    # before the donated/aliased kernel call:  x + lam * icv.repeat(B, S, 1)
    ref = x + lam * jnp.broadcast_to(icv, (B, S, H))
    ref = jax.block_until_ready(ref)

    out = icv_layer_jit(x, icv, lam)
    out = jax.block_until_ready(out)

    assert out.shape == (B, S, H)
    assert jnp.allclose(out, ref, atol=1e-6), "mismatch vs reference"

    print("KERNEL_OK")
</pallas_src>

<mosaic_0001>
module attributes {stable_mosaic.version = 11 : i64} {
  func.func @icv_kernel(%arg0: i32, %arg1: memref<4x128xf32, #tpu.memory_space<vmem>>, %arg2: memref<1x128xf32, #tpu.memory_space<vmem>>, %arg3: memref<4x128xf32, #tpu.memory_space<vmem>>) attributes {dimension_semantics = [#tpu.dimension_semantics<parallel>], iteration_bounds = array<i64: 1>, scalar_prefetch = 0 : i64, scratch_operands = 0 : i64, tpu.core_type = #tpu.core_type<tc>, window_params = [{transform_indices = @transform_0, window_bounds = array<i64: 4, 128>}, {pipeline_mode = #tpu.pipeline_mode<synchronous>, transform_indices = @transform_1, window_bounds = array<i64: 1, 128>}, {transform_indices = @transform_2, window_bounds = array<i64: 4, 128>}]} {
    %c0 = arith.constant 0 : index
    %c0_0 = arith.constant 0 : index
    %0 = vector.load %arg1[%c0, %c0_0] : memref<4x128xf32, #tpu.memory_space<vmem>>, vector<4x128xf32>
    %c0_1 = arith.constant 0 : index
    %c0_2 = arith.constant 0 : index
    %1 = vector.load %arg2[%c0_1, %c0_2] : memref<1x128xf32, #tpu.memory_space<vmem>>, vector<1x128xf32>
    %2 = vector.broadcast %1 : vector<1x128xf32> to vector<4x128xf32>
    %3 = arith.addf %0, %2 : vector<4x128xf32>
    %c0_3 = arith.constant 0 : index
    %c0_4 = arith.constant 0 : index
    %4 = vector.load %arg3[%c0_3, %c0_4] : memref<4x128xf32, #tpu.memory_space<vmem>>, vector<4x128xf32>
    tpu.vector_store %arg3[%c0_3, %c0_4], %3 {strides = array<i32>} : memref<4x128xf32, #tpu.memory_space<vmem>>, vector<4x128xf32>,
    return
  }
  func.func @transform_0(%arg0: i32) -> (i32, i32) {
    %c0_i32 = arith.constant 0 : i32
    %c0_i32_0 = arith.constant 0 : i32
    return %arg0, %c0_i32 : i32, i32
  }
  func.func @transform_1(%arg0: i32) -> (i32, i32) {
    %c0_i32 = arith.constant 0 : i32
    %c0_i32_0 = arith.constant 0 : i32
    %c0_i32_1 = arith.constant 0 : i32
    return %c0_i32, %c0_i32_0 : i32, i32
  }
  func.func @transform_2(%arg0: i32) -> (i32, i32) {
    %c0_i32 = arith.constant 0 : i32
    %c0_i32_0 = arith.constant 0 : i32
    return %arg0, %c0_i32 : i32, i32
  }
}

</mosaic_0001>

<bundles_post_ra>
// kernel: tile.9
= control target key start
LH: loop header
LB: loop body
LE: loop exit
PB: predicated region body
PF: predicated region fallthrough
CT: control target
= control target key end

     0   :  { %vm8_vm0 = vcmask 261120   ;;  %s40_s8 = smov 32   ;;  %s41_s9 = smov 64   ;;  %vm14_vm1 = vcmask 1048320   ;;  %vm20_vm2 = vcmask 785920   ;;  %vm26_vm3 = vcmask 523520   ;;  %s58_s0 = inlined_call_operand.vmem [shape: f32[4,32], index: 0, kind: input, shape index: {}]   ;;  %s59_s1 = inlined_call_operand.vmem [shape: f32[1,128], index: 1, kind: output, shape index: {}]  }
   0x1   :  { %v5_v0 = vld [vmem:[%s58_s0] sm:$0xf]  ;;  %s39_s0 = smov 96  }
   0x2   :  { %6 = vst [vmem:[#allocation1] sm:$0xf] %v5_v0 }
   0x9   :  { %v11_v1 = vld [vmem:[#allocation1 + $0x3] sm:$0x1]   ;;  %v23_v2 = vld [vmem:[#allocation1 + $0x1] sm:$0x1]   ;;  %v7_v3 = vld [vmem:[#allocation1] sm:$0x1]  }
   0xa   :  { %12 = vrot.lane.b32.xlu0 %v11_v1, %s39_s0  ;;  %24 = vrot.lane.b32.xlu1 %v23_v2, %s40_s8  ;;  %v17_v4 = vld [vmem:[#allocation1 + $0x2] sm:$0x1]   ;;  %9 = vst.msk [vmem:[#allocation0] sm:$0x1] %vm8_vm0, %v7_v3  }
   0xe   :  { %18 = vrot.lane.b32.xlu0 %v17_v4, %s41_s9 }
  0x7c   :  { %v13_v5 = vpop.permute.xlu0 %12   ;;  %v25_v6 = vpop.permute.xlu1 %24  }
  0x7d   :  { %15 = vst.msk [vmem:[#allocation0] sm:$0x1] %vm14_vm1, %v13_v5  }
  0x80   :  { %v19_v7 = vpop.permute.xlu0 %18  }
  0x81   :  { %21 = vst.msk [vmem:[#allocation0] sm:$0x1] %vm20_vm2, %v19_v7  }
  0x82   :  { %27 = vst.msk [vmem:[#allocation0] sm:$0x1] %vm26_vm3, %v25_v6  }
  0x89   :  { %v32_v8 = vld [vmem:[#allocation0] sm:$0x1] }
  0x8a   :  { %35 = vst [vmem:[%s59_s1] sm:$0x1] %v32_v8 }

// kernel: tile.8
= control target key start
LH: loop header
LB: loop body
LE: loop exit
PB: predicated region body
PF: predicated region fallthrough
CT: control target
= control target key end

     0   :  { %s22_s0 = inlined_call_operand.vmem [shape: f32[32], index: 0, kind: input, shape index: {}]   ;;  %s23_s1 = inlined_call_operand.vmem [shape: f32[4,32], index: 1, kind: output, shape index: {}]  }
   0x1   :  { %v4_v0 = vld [vmem:[%s22_s0] ss:$0 sm:$0xff] }
   0x2   :  { %5 = vst [vmem:[%s23_s1] sm:$0xf] %v4_v0 }

// kernel: icv_layer.1
= control target key start
LH: loop header
LB: loop body
LE: loop exit
PB: predicated region body
PF: predicated region fallthrough
CT: control target
= control target key end

     0   :  { %s50_s0 = inlined_call_operand.vmem [shape: f32[4,128], index: 0, kind: input, shape index: {}, may-alias: {0,2}]   ;;  %s51_s1 = inlined_call_operand.vmem [shape: f32[1,128], index: 1, kind: input, shape index: {}]   ;;  %s52_s2 = inlined_call_operand.vmem [shape: f32[4,128], index: 2, kind: output, shape index: {}, may-alias: {0,2}]  }
   0x1   :  { %v11_v0 = vld [vmem:[%s50_s0] sm:$0xf] }
   0x2   :  { %v25_v1 = vld [vmem:[%s51_s1] ss:$0 sm:$0xff] }
   0x3   :  { %v19_v2 = vadd.f32 %v25_v1, %v11_v0 }
   0x5   :  { %20 = vst [vmem:[%s52_s2] sm:$0xf] %v19_v2 }

</bundles_post_ra>
